<compile_context>
chip_gen: v5e
topology: v5e:2x2
jax: 0.10.0
libtpu: 0.0.40
codegen_flags: <defaults>
</compile_context>

<pallas_src>
import functools

import jax
import jax.numpy as jnp
from jax.experimental import pallas as pl
from jax.experimental.pallas import tpu as pltpu


HIDDEN = 128          # hard-coded by the module (two 128-wide hidden layers)
NUM_ACTIONS = 4       # the trailing Linear(4, 1) forces num_actions == 4
ACT_PAD = 8           # pad the 4-wide action dim to one full sublane group


def _round_up(x, m):
    return (x + m - 1) // m * m


def reward_kernel(x_ref, w1_ref, b1_ref, w2_ref, b2_ref,
                  w3t_ref, b3_ref, w4_ref, b4_ref, o_ref):
    """Fused 4-layer MLP for one TILE_B batch tile.

    x_ref  : (TILE_B, F)  bf16 VMEM, per-step block (F = num_obs + 1, concat folded in)
    w1/b1/w2/b2/w3t/b3/w4 :    VMEM, constant index_map (resident weights)
    b4_ref : (1,)         f32  SMEM scalar
    o_ref  : (1, TILE_B)  f32  VMEM, lane-dense per-step block
    """
    # ---- layer 1: Linear(num_obs + 1, 128) + ReLU --------------------------
    # x already contains the x1 column and is bf16 straight from HBM.
    h = jnp.dot(x_ref[...], w1_ref[...], preferred_element_type=jnp.float32)
    h = jnp.maximum(h + b1_ref[...], 0.0)

    # ---- layer 2: Linear(128, 128) + ReLU ----------------------------------
    h = jnp.dot(h.astype(jnp.bfloat16), w2_ref[...],
                preferred_element_type=jnp.float32)
    h = jnp.maximum(h + b2_ref[...], 0.0)                    # (TILE_B, 128) f32

    # ---- layers 3 + 4, evaluated transposed so the output is lane-dense ----
    # h^T : one 128-aligned f32 XLU transpose (runs in the XLU slot, overlaps
    # with MXU work); then Linear(128,4) becomes a tiny (8,128)@(128,TILE_B)
    # MXU matmul against a zero-padded W3^T, and Linear(4,1) is a lane-broadcast
    # bias + ReLU + weighted sublane reduce. The padded rows of W3^T / w4 are
    # zero, so they contribute nothing.
    ht = jnp.transpose(h).astype(jnp.bfloat16)                # (128, TILE_B)
    h3t = jnp.dot(w3t_ref[...], ht,
                  preferred_element_type=jnp.float32)         # (8, TILE_B) f32
    h3t = jnp.maximum(h3t + b3_ref[...], 0.0)                 # +b3, ReLU
    out_row = jnp.sum(h3t * w4_ref[...], axis=0, keepdims=True) + b4_ref[0]
    o_ref[...] = out_row                                      # (1, TILE_B) lane-dense


def reward_forward(x0, x1, params, *, tile_b=2048):
    """x0: (B, num_obs) f32, x1: (B,) f32. Returns (B, 1) f32."""
    (w1, b1), (w2, b2), (w3, b3), (w4, b4) = params
    B, num_obs = x0.shape
    num_actions = w3.shape[1]
    assert num_actions == NUM_ACTIONS and w4.shape == (NUM_ACTIONS, 1), (
        "the module hard-codes Linear(4, 1) after Linear(128, num_actions)")
    assert w1.shape == (num_obs + 1, HIDDEN)
    feat = num_obs + 1

    # torch.cat([x0, x1[:, None]]) done once wrapper-side, straight to bf16:
    # the concat already forces one materialization pass, so emitting bf16
    # halves the kernel's HBM read volume for free (MXU consumes bf16 anyway).
    x = jnp.concatenate(
        [x0.astype(jnp.float32), x1.astype(jnp.float32).reshape(B, 1)], axis=1
    ).astype(jnp.bfloat16)

    # Batch tiling: big tiles to amortize the ~0.35us per-grid-step overhead,
    # 128-aligned (lane-dense output / clean transposes), and >= 2 grid steps
    # whenever the batch allows it so both v7x TensorCores get work.
    tile_b = _round_up(max(1, min(tile_b, _round_up(B, 128))), 128)
    if _round_up(B, tile_b) // tile_b < 2 and B > 128:
        tile_b = _round_up(pl.cdiv(B, 2), 128)
    b_pad = _round_up(B, tile_b)
    if b_pad != B:
        # NOTE: padded rows still produce nonzero outputs (bias/ReLU
        # propagation); they are sliced off below before returning.
        x = jnp.pad(x, ((0, b_pad - B), (0, 0)))

    # Resident weights (fetched once, VMEM-resident across the whole grid).
    w1_bf = w1.astype(jnp.bfloat16)                              # (F, 128)
    w2_bf = w2.astype(jnp.bfloat16)                              # (128, 128)
    b1_f = b1.reshape(1, HIDDEN).astype(jnp.float32)
    b2_f = b2.reshape(1, HIDDEN).astype(jnp.float32)
    # Layer 3/4 constants in the transposed layout, padded 4 -> 8 rows with
    # zeros so the epilogue matmul/reduce works on a full sublane group.
    w3t_p = (jnp.zeros((ACT_PAD, HIDDEN), jnp.float32)
             .at[:NUM_ACTIONS].set(w3.T.astype(jnp.float32))
             .astype(jnp.bfloat16))                              # (8, 128)
    b3_c = (jnp.zeros((ACT_PAD, 1), jnp.float32)
            .at[:NUM_ACTIONS, 0].set(b3.reshape(-1).astype(jnp.float32)))
    w4_c = (jnp.zeros((ACT_PAD, 1), jnp.float32)
            .at[:NUM_ACTIONS, 0].set(w4.reshape(-1).astype(jnp.float32)))
    b4_s = b4.reshape(1).astype(jnp.float32)                    # SMEM scalar

    grid = (b_pad // tile_b,)

    def resident_spec(arr):
        return pl.BlockSpec(arr.shape, lambda i: (0, 0))

    out = pl.pallas_call(
        reward_kernel,
        out_shape=jax.ShapeDtypeStruct((1, b_pad), jnp.float32),
        grid=grid,
        in_specs=[
            pl.BlockSpec((tile_b, feat), lambda i: (i, 0)),   # x tile (bf16)
            resident_spec(w1_bf),
            resident_spec(b1_f),
            resident_spec(w2_bf),
            resident_spec(b2_f),
            resident_spec(w3t_p),
            resident_spec(b3_c),
            resident_spec(w4_c),
            pl.BlockSpec(memory_space=pltpu.SMEM),            # b4 scalar
        ],
        # Lane-dense output: each step writes a disjoint (1, tile_b) row block.
        out_specs=pl.BlockSpec((1, tile_b), lambda i: (0, i)),
        compiler_params=pltpu.CompilerParams(
            dimension_semantics=("parallel",),       # batch axis -> megacore
            vmem_limit_bytes=32 * 1024 * 1024,       # headroom for big tiles (v5e default is 16 MiB)
        ),
    )(x, w1_bf, b1_f, w2_bf, b2_f, w3t_p, b3_c, w4_c, b4_s)

    return out.reshape(-1)[:B].reshape(B, 1)


def init_params(key, num_obs, num_actions):
    """Deterministic init mirroring nn.Linear's U(-1/sqrt(fan_in), 1/sqrt(fan_in)).
    Weights stored as (in_features, out_features); biases as (1, out_features)."""
    dims = [(num_obs + 1, HIDDEN), (HIDDEN, HIDDEN), (HIDDEN, num_actions), (4, 1)]
    params = []
    for (fan_in, fan_out) in dims:
        key, kw, kb = jax.random.split(key, 3)
        bound = 1.0 / (fan_in ** 0.5)
        w = jax.random.uniform(kw, (fan_in, fan_out), jnp.float32, -bound, bound)
        b = jax.random.uniform(kb, (1, fan_out), jnp.float32, -bound, bound)
        params.append((w, b))
    return params


def reward_reference_f32(x0, x1, params):
    """Full-precision f32 reference (the PyTorch module numerics)."""
    x = jnp.concatenate([x0, x1[:, None]], axis=1)
    (w1, b1), (w2, b2), (w3, b3), (w4, b4) = params
    hi = jax.lax.Precision.HIGHEST
    h = jnp.maximum(jnp.dot(x, w1, precision=hi) + b1, 0.0)
    h = jnp.maximum(jnp.dot(h, w2, precision=hi) + b2, 0.0)
    h = jnp.maximum(jnp.dot(h, w3, precision=hi) + b3, 0.0)
    return jnp.dot(h, w4, precision=hi) + b4


def reward_reference_mixed(x0, x1, params):
    """Pure-JAX reference mirroring the kernel's precision exactly
    (bf16 inputs/MXU operands, f32 accumulation, f32 VPU/XLU epilogue)."""
    (w1, b1), (w2, b2), (w3, b3), (w4, b4) = params
    x = jnp.concatenate([x0, x1[:, None]], axis=1).astype(jnp.bfloat16)
    h = jnp.dot(x, w1.astype(jnp.bfloat16), preferred_element_type=jnp.float32)
    h = jnp.maximum(h + b1, 0.0)
    h = jnp.dot(h.astype(jnp.bfloat16), w2.astype(jnp.bfloat16),
                preferred_element_type=jnp.float32)
    h = jnp.maximum(h + b2, 0.0)
    h = jnp.dot(h.astype(jnp.bfloat16), w3.astype(jnp.bfloat16),
                preferred_element_type=jnp.float32)
    h = jnp.maximum(h + b3, 0.0)
    return jnp.sum(h * w4.reshape(1, -1), axis=1, keepdims=True) + b4


if __name__ == "__main__":
    num_obs = 31          # so num_obs + 1 = 32 input features
    num_actions = 4       # last layer is Linear(4, 1) => num_actions must be 4
    batch = 200           # small, but exercises tiling, padding and a 2-step grid

    key = jax.random.PRNGKey(0)
    kx0, kx1, kp = jax.random.split(key, 3)
    x0 = jax.random.normal(kx0, (batch, num_obs), jnp.float32)
    x1 = jax.random.normal(kx1, (batch,), jnp.float32)
    params = init_params(kp, num_obs, num_actions)

    # Default tile_b=2048 is clamped down for the tiny demo batch: 200 rows ->
    # tile_b=128, batch padded to 256, grid of 2 steps (pipelined + megacore path).
    fwd = jax.jit(functools.partial(reward_forward))
    out = jax.block_until_ready(fwd(x0, x1, params))

    assert out.shape == (batch, 1), out.shape

    ref_mixed = reward_reference_mixed(x0, x1, params)
    assert jnp.allclose(out, ref_mixed, atol=5e-3, rtol=5e-3), (
        "mismatch vs precision-matched (bf16 MXU / f32 accumulate) reference")

    ref_f32 = reward_reference_f32(x0, x1, params)
    assert jnp.allclose(out, ref_f32, atol=5e-2, rtol=5e-2), (
        "mismatch vs full-f32 reference")

    print("KERNEL_OK")
</pallas_src>

<mosaic_0001>
module attributes {stable_mosaic.version = 11 : i64} {
  func.func @reward_kernel(%arg0: i32, %arg1: memref<128x32xbf16, #tpu.memory_space<vmem>>, %arg2: memref<32x128xbf16, #tpu.memory_space<vmem>>, %arg3: memref<1x128xf32, #tpu.memory_space<vmem>>, %arg4: memref<128x128xbf16, #tpu.memory_space<vmem>>, %arg5: memref<1x128xf32, #tpu.memory_space<vmem>>, %arg6: memref<8x128xbf16, #tpu.memory_space<vmem>>, %arg7: memref<8x1xf32, #tpu.memory_space<vmem>>, %arg8: memref<8x1xf32, #tpu.memory_space<vmem>>, %arg9: memref<1xf32, #tpu.memory_space<smem>>, %arg10: memref<1x128xf32, #tpu.memory_space<vmem>>) attributes {dimension_semantics = [#tpu.dimension_semantics<parallel>], iteration_bounds = array<i64: 2>, scalar_prefetch = 0 : i64, scratch_operands = 0 : i64, tpu.core_type = #tpu.core_type<tc>, window_params = [{transform_indices = @transform_0, window_bounds = array<i64: 128, 32>}, {pipeline_mode = #tpu.pipeline_mode<synchronous>, transform_indices = @transform_1, window_bounds = array<i64: 32, 128>}, {pipeline_mode = #tpu.pipeline_mode<synchronous>, transform_indices = @transform_2, window_bounds = array<i64: 1, 128>}, {pipeline_mode = #tpu.pipeline_mode<synchronous>, transform_indices = @transform_3, window_bounds = array<i64: 128, 128>}, {pipeline_mode = #tpu.pipeline_mode<synchronous>, transform_indices = @transform_4, window_bounds = array<i64: 1, 128>}, {pipeline_mode = #tpu.pipeline_mode<synchronous>, transform_indices = @transform_5, window_bounds = array<i64: 8, 128>}, {pipeline_mode = #tpu.pipeline_mode<synchronous>, transform_indices = @transform_6, window_bounds = array<i64: 8, 1>}, {pipeline_mode = #tpu.pipeline_mode<synchronous>, transform_indices = @transform_7, window_bounds = array<i64: 8, 1>}, {transform_indices = @transform_8, window_bounds = array<i64: 1>}, {transform_indices = @transform_9, window_bounds = array<i64: 1, 128>}]} {
    %c0 = arith.constant 0 : index
    %c0_0 = arith.constant 0 : index
    %0 = vector.load %arg1[%c0, %c0_0] : memref<128x32xbf16, #tpu.memory_space<vmem>>, vector<128x32xbf16>
    %c0_1 = arith.constant 0 : index
    %c0_2 = arith.constant 0 : index
    %1 = vector.load %arg2[%c0_1, %c0_2] : memref<32x128xbf16, #tpu.memory_space<vmem>>, vector<32x128xbf16>
    %cst = arith.constant dense<0.000000e+00> : vector<128x128xf32>
    %2 = tpu.matmul %0, %1, %cst {dimension_numbers = #tpu.dot_dimension_numbers<[1], [0], [0], [1], [0, 0, 1, 1], [], []>} : vector<128x32xbf16>, vector<32x128xbf16>, vector<128x128xf32> -> vector<128x128xf32>
    %c0_3 = arith.constant 0 : index
    %c0_4 = arith.constant 0 : index
    %3 = vector.load %arg3[%c0_3, %c0_4] : memref<1x128xf32, #tpu.memory_space<vmem>>, vector<1x128xf32>
    %4 = vector.broadcast %3 : vector<1x128xf32> to vector<128x128xf32>
    %5 = arith.addf %2, %4 : vector<128x128xf32>
    %cst_5 = arith.constant 0.000000e+00 : f32
    %6 = vector.broadcast %cst_5 : f32 to vector<128x128xf32>
    %7 = arith.maximumf %5, %6 : vector<128x128xf32>
    %8 = arith.truncf %7 : vector<128x128xf32> to vector<128x128xbf16>
    %c0_6 = arith.constant 0 : index
    %c0_7 = arith.constant 0 : index
    %9 = vector.load %arg4[%c0_6, %c0_7] : memref<128x128xbf16, #tpu.memory_space<vmem>>, vector<128x128xbf16>
    %cst_8 = arith.constant dense<0.000000e+00> : vector<128x128xf32>
    %10 = tpu.matmul %8, %9, %cst_8 {dimension_numbers = #tpu.dot_dimension_numbers<[1], [0], [0], [1], [0, 0, 1, 1], [], []>} : vector<128x128xbf16>, vector<128x128xbf16>, vector<128x128xf32> -> vector<128x128xf32>
    %c0_9 = arith.constant 0 : index
    %c0_10 = arith.constant 0 : index
    %11 = vector.load %arg5[%c0_9, %c0_10] : memref<1x128xf32, #tpu.memory_space<vmem>>, vector<1x128xf32>
    %12 = vector.broadcast %11 : vector<1x128xf32> to vector<128x128xf32>
    %13 = arith.addf %10, %12 : vector<128x128xf32>
    %cst_11 = arith.constant 0.000000e+00 : f32
    %14 = vector.broadcast %cst_11 : f32 to vector<128x128xf32>
    %15 = arith.maximumf %13, %14 : vector<128x128xf32>
    %16 = tpu.transpose %15, [1, 0] : vector<128x128xf32> -> vector<128x128xf32>
    %17 = arith.truncf %16 : vector<128x128xf32> to vector<128x128xbf16>
    %c0_12 = arith.constant 0 : index
    %c0_13 = arith.constant 0 : index
    %18 = vector.load %arg6[%c0_12, %c0_13] : memref<8x128xbf16, #tpu.memory_space<vmem>>, vector<8x128xbf16>
    %cst_14 = arith.constant dense<0.000000e+00> : vector<8x128xf32>
    %19 = tpu.matmul %18, %17, %cst_14 {dimension_numbers = #tpu.dot_dimension_numbers<[1], [0], [0], [1], [0, 0, 1, 1], [], []>} : vector<8x128xbf16>, vector<128x128xbf16>, vector<8x128xf32> -> vector<8x128xf32>
    %c0_15 = arith.constant 0 : index
    %c0_16 = arith.constant 0 : index
    %20 = vector.load %arg7[%c0_15, %c0_16] : memref<8x1xf32, #tpu.memory_space<vmem>>, vector<8x1xf32>
    %21 = vector.broadcast %20 : vector<8x1xf32> to vector<8x128xf32>
    %22 = arith.addf %19, %21 : vector<8x128xf32>
    %cst_17 = arith.constant 0.000000e+00 : f32
    %23 = vector.broadcast %cst_17 : f32 to vector<8x128xf32>
    %24 = arith.maximumf %22, %23 : vector<8x128xf32>
    %c0_18 = arith.constant 0 : index
    %c0_19 = arith.constant 0 : index
    %25 = vector.load %arg8[%c0_18, %c0_19] : memref<8x1xf32, #tpu.memory_space<vmem>>, vector<8x1xf32>
    %26 = vector.broadcast %25 : vector<8x1xf32> to vector<8x128xf32>
    %27 = arith.mulf %24, %26 : vector<8x128xf32>
    %cst_20 = arith.constant dense<0.000000e+00> : vector<128xf32>
    %28 = vector.multi_reduction <add>, %27, %cst_20 [0] : vector<8x128xf32> to vector<128xf32>
    %29 = vector.shape_cast %28 : vector<128xf32> to vector<1x128xf32>
    %c0_21 = arith.constant 0 : index
    %30 = memref.load %arg9[%c0_21] : memref<1xf32, #tpu.memory_space<smem>>
    %31 = vector.broadcast %30 : f32 to vector<1x128xf32>
    %32 = arith.addf %29, %31 : vector<1x128xf32>
    %c0_22 = arith.constant 0 : index
    %c0_23 = arith.constant 0 : index
    %33 = vector.load %arg10[%c0_22, %c0_23] : memref<1x128xf32, #tpu.memory_space<vmem>>, vector<1x128xf32>
    tpu.vector_store %arg10[%c0_22, %c0_23], %32 {strides = array<i32>} : memref<1x128xf32, #tpu.memory_space<vmem>>, vector<1x128xf32>,
    return
  }
  func.func @transform_0(%arg0: i32) -> (i32, i32) {
    %c0_i32 = arith.constant 0 : i32
    %c0_i32_0 = arith.constant 0 : i32
    return %arg0, %c0_i32 : i32, i32
  }
  func.func @transform_1(%arg0: i32) -> (i32, i32) {
    %c0_i32 = arith.constant 0 : i32
    %c0_i32_0 = arith.constant 0 : i32
    %c0_i32_1 = arith.constant 0 : i32
    return %c0_i32, %c0_i32_0 : i32, i32
  }
  func.func @transform_2(%arg0: i32) -> (i32, i32) {
    %c0_i32 = arith.constant 0 : i32
    %c0_i32_0 = arith.constant 0 : i32
    %c0_i32_1 = arith.constant 0 : i32
    return %c0_i32, %c0_i32_0 : i32, i32
  }
  func.func @transform_3(%arg0: i32) -> (i32, i32) {
    %c0_i32 = arith.constant 0 : i32
    %c0_i32_0 = arith.constant 0 : i32
    %c0_i32_1 = arith.constant 0 : i32
    return %c0_i32, %c0_i32_0 : i32, i32
  }
  func.func @transform_4(%arg0: i32) -> (i32, i32) {
    %c0_i32 = arith.constant 0 : i32
    %c0_i32_0 = arith.constant 0 : i32
    %c0_i32_1 = arith.constant 0 : i32
    return %c0_i32, %c0_i32_0 : i32, i32
  }
  func.func @transform_5(%arg0: i32) -> (i32, i32) {
    %c0_i32 = arith.constant 0 : i32
    %c0_i32_0 = arith.constant 0 : i32
    %c0_i32_1 = arith.constant 0 : i32
    return %c0_i32, %c0_i32_0 : i32, i32
  }
  func.func @transform_6(%arg0: i32) -> (i32, i32) {
    %c0_i32 = arith.constant 0 : i32
    %c0_i32_0 = arith.constant 0 : i32
    %c0_i32_1 = arith.constant 0 : i32
    return %c0_i32, %c0_i32_0 : i32, i32
  }
  func.func @transform_7(%arg0: i32) -> (i32, i32) {
    %c0_i32 = arith.constant 0 : i32
    %c0_i32_0 = arith.constant 0 : i32
    %c0_i32_1 = arith.constant 0 : i32
    return %c0_i32, %c0_i32_0 : i32, i32
  }
  func.func @transform_8(%arg0: i32) -> i32 {
    %c0_i32 = arith.constant 0 : i32
    %c0_i32_0 = arith.constant 0 : i32
    return %c0_i32 : i32
  }
  func.func @transform_9(%arg0: i32) -> (i32, i32) {
    %c0_i32 = arith.constant 0 : i32
    %c0_i32_0 = arith.constant 0 : i32
    return %c0_i32, %arg0 : i32, i32
  }
}

</mosaic_0001>

<bundles_post_ra>
// kernel: reward_forward.1
= control target key start
LH: loop header
LB: loop body
LE: loop exit
PB: predicated region body
PF: predicated region fallthrough
CT: control target
= control target key end

     0   :  { %s957_s11 = smov 0   ;;  %s1032_s0 = inlined_call_operand.vmem [shape: bf16[256,32], index: 0, kind: input, shape index: {}]   ;;  %s1033_s1 = inlined_call_operand.vmem [shape: bf16[32,128], index: 1, kind: input, shape index: {}]   ;;  %s1034_s2 = inlined_call_operand.vmem [shape: f32[1,128], index: 2, kind: input, shape index: {}]   ;;  %s1035_s3 = inlined_call_operand.vmem [shape: bf16[128,128], index: 3, kind: input, shape index: {}]   ;;  %s1036_s4 = inlined_call_operand.vmem [shape: f32[1,128], index: 4, kind: input, shape index: {}]   ;;  %s1037_s5 = inlined_call_operand.vmem [shape: bf16[8,128], index: 5, kind: input, shape index: {}]   ;;  %s1038_s6 = inlined_call_operand.vmem [shape: f32[8,1], index: 6, kind: input, shape index: {}]   ;;  %s1039_s7 = inlined_call_operand.vmem [shape: f32[8,1], index: 7, kind: input, shape index: {}]   ;;  %s1040_s8 = inlined_call_operand.<no memory space> [shape: f32[1], index: 8, kind: input, shape index: {}]   ;;  %s1041_s9 = inlined_call_operand.vmem [shape: f32[1,256], index: 9, kind: output, shape index: {}]  }
   0x1   :  { %14 = sst [smem:[#allocation2]] %s1040_s8 }
   0x2 LB: > { %s963_s12 = sadd.s32 4294967295, %s901_s11   ;;  %p769_p0 = scmp.ge.s32.totalorder %s901_s11, 1  ;;  %s901_s11 = sphi %s957_s11, %s20_s11  }
   0x3   : > { %p289_p1 = scmp.lt.s32.totalorder %s901_s11, 3 }
   0x5   : > { %p290_p2 = pnand %p769_p0, %p289_p1 }
   0x6   : > { %s770_s8 = sshll.u32 (!%p290_p2), %s963_s12, 4  ;;  %s714_s27 = sld [smem:[#allocation2]] (!%p290_p2) }
   0x7   : > { %293 = sbr.rel (%p290_p2) target bundleno = 767 (0x2ff), region = 56  ;;  %p324_p3 = scmp.lt.s32.totalorder (!%p290_p2), %s770_s8, 31 }
   0x8   : > { %p329_p4 = scmp.lt.s32.totalorder (!%p290_p2), %s963_s12, 1 }
   0xc   : > { %v863_v0 = vld [vmem:[%s1033_s1 + $0x8] sm:$0xff]  ;;  %v862_v1 = vld [vmem:[%s1033_s1] sm:$0xff]  ;;  %s1043_s8 = smov (!%p324_p3, %s770_s8), 31  ;;  %vm409_vm0 = vcmask 261120   ;;  %v871_v6 = vld [vmem:[%s1035_s3 + $0x38] sm:$0xff]  ;;  %s1045_s12 = smov (!%p329_p4, %s963_s12), 1 }
   0xd   : > { %440 = vmatpush.bf16.msra.mxu0 %v863_v0  ;;  %872 = vmatpush.bf16.msra.mxu2 %v863_v0  ;;  %s771_s17 = sshll.u32 %s1043_s8, 2  ;;  %v870_v7 = vld [vmem:[%s1035_s3 + $0x30] sm:$0xff]  ;;  %v869_v8 = vld [vmem:[%s1035_s3 + $0x28] sm:$0xff]  ;;  %v868_v10 = vld [vmem:[%s1035_s3 + $0x20] sm:$0xff]  ;;  %s331_s30 = scalar_lea.vmem %s1041_s9, %s1045_s12 }
   0xe   : > { %s327_s20 = scalar_lea.vmem %s1032_s0, %s771_s17  ;;  %575 = vmatpush.bf16.msra.mxu1 %v871_v6  ;;  %874 = vmatpush.bf16.msra.mxu3 %v871_v6  ;;  %v867_v14 = vld [vmem:[%s1035_s3 + $0x18] sm:$0xff]  ;;  %v866_v15 = vld [vmem:[%s1035_s3 + $0x10] sm:$0xff]  ;;  %v865_v16 = vld [vmem:[%s1035_s3 + $0x8] sm:$0xff] }
   0xf   : > { %v854_v2 = vld [vmem:[%s327_s20] sm:$0xff]  ;;  %v855_v3 = vld [vmem:[%s327_s20 + $0x8] sm:$0xff]  ;;  %v856_v4 = vld [vmem:[%s327_s20 + $0x10] sm:$0xff] }
  0x10   : > { %v859_v5 = vld [vmem:[%s327_s20 + $0x28] sm:$0xff]  ;;  %v857_v9 = vld [vmem:[%s327_s20 + $0x18] sm:$0xff]  ;;  %v860_v11 = vld [vmem:[%s327_s20 + $0x30] sm:$0xff] }
  0x11   : > { %441 = vmatpush.bf16.msra.mxu0 %v862_v1  ;;  %873 = vmatpush.bf16.msra.mxu2 %v862_v1  ;;  %v858_v12 = vld [vmem:[%s327_s20 + $0x20] sm:$0xff]  ;;  %v861_v13 = vld [vmem:[%s327_s20 + $0x38] sm:$0xff] }
  0x12   : > { %576 = vmatpush.bf16.msra.mxu1 %v870_v7  ;;  %875 = vmatpush.bf16.msra.mxu3 %v870_v7  ;;  %v864_v17 = vld [vmem:[%s1035_s3] sm:$0xff] }
  0x13   : > { %v893_v19 = vld [vmem:[%s1034_s2] ss:$0 sm:$0xff] }
  0x14   : > { %812 = vmatmul.msk.bf16.vlgmr.msra.gmra.mxu0 %vm409_vm0, %v854_v2  ;;  %817 = vmatmul.msk.bf16.vlgmr.msra.gmra.mxu2 %vm409_vm0, %v859_v5 }
  0x16   : > { %577 = vmatpush.bf16.msra.mxu1 %v869_v8  ;;  %876 = vmatpush.bf16.msra.mxu3 %v869_v8 }
  0x1a   : > { %578 = vmatpush.bf16.msra.mxu1 %v868_v10  ;;  %877 = vmatpush.bf16.msra.mxu3 %v868_v10 }
  0x1e   : > { %579 = vmatpush.bf16.msra.mxu1 %v867_v14  ;;  %878 = vmatpush.bf16.msra.mxu3 %v867_v14 }
  0x22   : > { %580 = vmatpush.bf16.msra.mxu1 %v866_v15  ;;  %879 = vmatpush.bf16.msra.mxu3 %v866_v15 }
  0x24   : > { %813 = vmatmul.msk.bf16.gmra.mxu0 %vm409_vm0, %v855_v3  ;;  %818 = vmatmul.msk.bf16.gmra.mxu2 %vm409_vm0, %v860_v11  ;;  %v894_v11 = vld [vmem:[%s1036_s4] ss:$0 sm:$0xff] }
  0x26   : > { %581 = vmatpush.bf16.msra.mxu1 %v865_v16  ;;  %880 = vmatpush.bf16.msra.mxu3 %v865_v16 }
  0x2a   : > { %582 = vmatpush.bf16.msra.mxu1 %v864_v17  ;;  %881 = vmatpush.bf16.msra.mxu3 %v864_v17 }
  0x34   : > { %814 = vmatmul.msk.bf16.gmra.mxu0 %vm409_vm0, %v856_v4  ;;  %819 = vmatmul.msk.bf16.gmra.mxu2 %vm409_vm0, %v861_v13 }
  0x44   : > { %815 = vmatmul.msk.bf16.gmra.mxu0 %vm409_vm0, %v857_v9 }
  0x54   : > { %816 = vmatmul.msk.bf16.gmra.mxu0 %vm409_vm0, %v858_v12 }
  0x91   : > { %v443_v18 = vpop.f32.mrf.mxu0 }
  0x92   : > { %v444_v20 = vadd.f32 %v893_v19, %v443_v18 }
  0x94   : > { %v483_v23 = vmax.f32 %v444_v20, 0.0 }
  0x97   : > { %v468_v48 = vpop.f32.mrf.mxu2 }
  0x98   : > { %v469_v57 = vadd.f32 %v893_v19, %v468_v48 }
  0x99   : > { %v445_v21 = vpop.f32.mrf.mxu0 }
  0x9a   : > { %v446_v22 = vadd.f32 %v893_v19, %v445_v21  ;;  %v493_v59 = vmax.f32 %v469_v57, 0.0 }
  0x9c   : > { %v484_v24 = vmax.f32 %v446_v22, 0.0 }
  0x9e   : > { %v499_v25 = vpack.c.bf16 %v484_v24, %v483_v23 }
  0x9f   : > { %v470_v52 = vpop.f32.mrf.mxu2 }
  0xa0   : > { %583 = vmatmul.bf16.vlgmr.msra.gmra.mxu1 %v499_v25  ;;  %v471_v58 = vadd.f32 %v893_v19, %v470_v52 }
  0xa1   : > { %v448_v26 = vpop.f32.mrf.mxu0 }
  0xa2   : > { %v449_v27 = vadd.f32 %v893_v19, %v448_v26  ;;  %v494_v60 = vmax.f32 %v471_v58, 0.0 }
  0xa4   : > { %v485_v30 = vmax.f32 %v449_v27, 0.0  ;;  %v504_v61 = vpack.c.bf16 %v494_v60, %v493_v59 }
  0xa7   : > { %v473_v56 = vpop.f32.mrf.mxu2 }
  0xa8   : > { %v474_v63 = vadd.f32 %v893_v19, %v473_v56 }
  0xa9   : > { %v450_v28 = vpop.f32.mrf.mxu0 }
  0xaa   : > { %v451_v29 = vadd.f32 %v893_v19, %v450_v28  ;;  %v495_v2 = vmax.f32 %v474_v63, 0.0 }
  0xac   : > { %v486_v31 = vmax.f32 %v451_v29, 0.0 }
  0xae   : > { %v500_v32 = vpack.c.bf16 %v486_v31, %v485_v30 }
  0xaf   : > { %v475_v62 = vpop.f32.mrf.mxu2 }
  0xb0   : > { %588 = vmatmul.bf16.gmra.mxu1 %v500_v32  ;;  %v476_v0 = vadd.f32 %v893_v19, %v475_v62 }
  0xb1   : > { %v453_v33 = vpop.f32.mrf.mxu0 }
  0xb2   : > { %v454_v34 = vadd.f32 %v893_v19, %v453_v33  ;;  %v496_v3 = vmax.f32 %v476_v0, 0.0 }
  0xb4   : > { %v487_v37 = vmax.f32 %v454_v34, 0.0  ;;  %v505_v4 = vpack.c.bf16 %v496_v3, %v495_v2 }
  0xb7   : > { %v478_v1 = vpop.f32.mrf.mxu2 }
  0xb8   : > { %v479_v6 = vadd.f32 %v893_v19, %v478_v1 }
  0xb9   : > { %v455_v35 = vpop.f32.mrf.mxu0 }
  0xba   : > { %v456_v36 = vadd.f32 %v893_v19, %v455_v35  ;;  %v497_v8 = vmax.f32 %v479_v6, 0.0 }
  0xbc   : > { %v488_v38 = vmax.f32 %v456_v36, 0.0 }
  0xbe   : > { %v501_v39 = vpack.c.bf16 %v488_v38, %v487_v37 }
  0xbf   : > { %v480_v5 = vpop.f32.mrf.mxu2 }
  0xc0   : > { %593 = vmatmul.bf16.gmra.mxu1 %v501_v39  ;;  %v481_v7 = vadd.f32 %v893_v19, %v480_v5 }
  0xc1   : > { %v458_v40 = vpop.f32.mrf.mxu0 }
  0xc2   : > { %v459_v41 = vadd.f32 %v893_v19, %v458_v40  ;;  %v498_v9 = vmax.f32 %v481_v7, 0.0 }
  0xc4   : > { %v489_v44 = vmax.f32 %v459_v41, 0.0  ;;  %v506_v10 = vpack.c.bf16 %v498_v9, %v497_v8 }
  0xc9   : > { %v460_v42 = vpop.f32.mrf.mxu0 }
  0xca   : > { %v461_v43 = vadd.f32 %v893_v19, %v460_v42 }
  0xcc   : > { %v490_v45 = vmax.f32 %v461_v43, 0.0 }
  0xce   : > { %v502_v46 = vpack.c.bf16 %v490_v45, %v489_v44 }
  0xd0   : > { %598 = vmatmul.bf16.gmra.mxu1 %v502_v46 }
  0xd1   : > { %v463_v47 = vpop.f32.mrf.mxu0 }
  0xd2   : > { %v464_v49 = vadd.f32 %v893_v19, %v463_v47 }
  0xd4   : > { %v491_v53 = vmax.f32 %v464_v49, 0.0 }
  0xd9   : > { %v465_v50 = vpop.f32.mrf.mxu0 }
  0xda   : > { %v466_v51 = vadd.f32 %v893_v19, %v465_v50 }
  0xdc   : > { %v492_v54 = vmax.f32 %v466_v51, 0.0 }
  0xde   : > { %v503_v55 = vpack.c.bf16 %v492_v54, %v491_v53 }
  0xe0   : > { %603 = vmatmul.bf16.vlgmr.msra.gmra.mxu3 %v503_v55 }
  0xf0   : > { %608 = vmatmul.bf16.gmra.mxu3 %v504_v61 }
 0x100   : > { %613 = vmatmul.bf16.gmra.mxu3 %v505_v4 }
 0x110   : > { %618 = vmatmul.bf16.gmra.mxu3 %v506_v10 }
 0x11d   : > { %v584_v12 = vpop.f32.mrf.mxu1 }
 0x11e   : > { %v585_v13 = vadd.f32 %v894_v11, %v584_v12 }
 0x120   : > { %v624_v14 = vmax.f32 %v585_v13, 0.0 }
 0x122   : > { %640 = vxpose.xlu0.b32.start [1/16] %v624_v14, 128 }
 0x125   : > { %v586_v15 = vpop.f32.mrf.mxu1 }
 0x126   : > { %v587_v16 = vadd.f32 %v894_v11, %v586_v15 }
 0x128   : > { %v625_v17 = vmax.f32 %v587_v16, 0.0 }
 0x12a   : > { %641 = vxpose.xlu0.b32.cont [2/16] %v625_v17, 128  ;;  %v681_v17 = vld [vmem:[%s1038_s6] sm:$0xff] }
 0x12d   : > { %v589_v18 = vpop.f32.mrf.mxu1 }
 0x12e   : > { %v590_v20 = vadd.f32 %v894_v11, %v589_v18  ;;  %v903_v18 = vmov 0  }
 0x12f   : > { %891 = vset.pattern.permute.xlu1 %v903_v18 }
 0x130   : > { %v626_v21 = vmax.f32 %v590_v20, 0.0  ;;  %684 = vperm.xlu1 %891, %v681_v17  }
 0x132   : > { %642 = vxpose.xlu0.b32.cont [3/16] %v626_v21, 128 }
 0x135   : > { %v591_v19 = vpop.f32.mrf.mxu1 }
 0x136   : > { %v592_v22 = vadd.f32 %v894_v11, %v591_v19  ;;  %v701_v19 = vld [vmem:[%s1039_s7] sm:$0xff] }
 0x138   : > { %v627_v23 = vmax.f32 %v592_v22, 0.0  ;;  %704 = vperm.xlu1 %891, %v701_v19  }
 0x13a   : > { %643 = vxpose.xlu0.b32.cont [4/16] %v627_v23, 128  ;;  %v680_v23 = vld [vmem:[%s1037_s5] sm:$0xf] }
 0x13d   : > { %v594_v24 = vpop.f32.mrf.mxu1 }
 0x13e   : > { %v595_v25 = vadd.f32 %v894_v11, %v594_v24 }
 0x140   : > { %v628_v26 = vmax.f32 %v595_v25, 0.0 }
 0x142   : > { %644 = vxpose.xlu0.b32.cont [5/16] %v628_v26, 128 }
 0x145   : > { %v596_v27 = vpop.f32.mrf.mxu1 }
 0x146   : > { %v597_v28 = vadd.f32 %v894_v11, %v596_v27 }
 0x148   : > { %v629_v29 = vmax.f32 %v597_v28, 0.0 }
 0x14a   : > { %645 = vxpose.xlu0.b32.cont [6/16] %v629_v29, 128 }
 0x14d   : > { %v599_v30 = vpop.f32.mrf.mxu1 }
 0x14e   : > { %v600_v31 = vadd.f32 %v894_v11, %v599_v30 }
 0x150   : > { %v630_v32 = vmax.f32 %v600_v31, 0.0 }
 0x152   : > { %646 = vxpose.xlu0.b32.cont [7/16] %v630_v32, 128 }
 0x155   : > { %v601_v33 = vpop.f32.mrf.mxu1 }
 0x156   : > { %v602_v34 = vadd.f32 %v894_v11, %v601_v33 }
 0x158   : > { %v631_v35 = vmax.f32 %v602_v34, 0.0 }
 0x15a   : > { %647 = vxpose.xlu0.b32.cont [8/16] %v631_v35, 128 }
 0x163   : > { %v604_v36 = vpop.f32.mrf.mxu3 }
 0x164   : > { %v605_v37 = vadd.f32 %v894_v11, %v604_v36  ;;  %v715_v36 = vstv %s714_s27 }
 0x166   : > { %v632_v38 = vmax.f32 %v605_v37, 0.0 }
 0x168   : > { %648 = vxpose.xlu0.b32.cont [9/16] %v632_v38, 128 }
 0x16b   : > { %v606_v39 = vpop.f32.mrf.mxu3 }
 0x16c   : > { %v607_v40 = vadd.f32 %v894_v11, %v606_v39 }
 0x16e   : > { %v633_v41 = vmax.f32 %v607_v40, 0.0 }
 0x170   : > { %649 = vxpose.xlu0.b32.cont [10/16] %v633_v41, 128 }
 0x173   : > { %v609_v42 = vpop.f32.mrf.mxu3 }
 0x174   : > { %v610_v43 = vadd.f32 %v894_v11, %v609_v42 }
 0x176   : > { %v634_v44 = vmax.f32 %v610_v43, 0.0 }
 0x178   : > { %650 = vxpose.xlu0.b32.cont [11/16] %v634_v44, 128 }
 0x17b   : > { %v611_v45 = vpop.f32.mrf.mxu3 }
 0x17c   : > { %v612_v46 = vadd.f32 %v894_v11, %v611_v45 }
 0x17e   : > { %v635_v47 = vmax.f32 %v612_v46, 0.0 }
 0x180   : > { %651 = vxpose.xlu0.b32.cont [12/16] %v635_v47, 128 }
 0x183   : > { %v614_v48 = vpop.f32.mrf.mxu3 }
 0x184   : > { %v615_v49 = vadd.f32 %v894_v11, %v614_v48 }
 0x186   : > { %v636_v50 = vmax.f32 %v615_v49, 0.0 }
 0x188   : > { %652 = vxpose.xlu0.b32.cont [13/16] %v636_v50, 128 }
 0x18b   : > { %v616_v51 = vpop.f32.mrf.mxu3 }
 0x18c   : > { %v617_v52 = vadd.f32 %v894_v11, %v616_v51 }
 0x18e   : > { %v637_v53 = vmax.f32 %v617_v52, 0.0 }
 0x190   : > { %653 = vxpose.xlu0.b32.cont [14/16] %v637_v53, 128 }
 0x193   : > { %v619_v54 = vpop.f32.mrf.mxu3 }
 0x194   : > { %v620_v55 = vadd.f32 %v894_v11, %v619_v54 }
 0x196   : > { %v638_v56 = vmax.f32 %v620_v55, 0.0 }
 0x198   : > { %654 = vxpose.xlu0.b32.cont [15/16] %v638_v56, 128 }
 0x19b   : > { %v621_v57 = vpop.f32.mrf.mxu3 }
 0x19c   : > { %v622_v58 = vadd.f32 %v894_v11, %v621_v57 }
 0x19e   : > { %v639_v59 = vmax.f32 %v622_v58, 0.0 }
 0x1a0   : > { %655 = vxpose.xlu0.b32.end [16/16] %v639_v59, 128 }
 0x1a2   : > { %v685_v24 = vpop.permute.xlu1 %684 }
 0x1aa   : > { %v705_v28 = vpop.permute.xlu1 %704 }
 0x1cc   : > { %v656_v60 = vpop.trf.xlu0 }
 0x1d4   : > { %v657_v61 = vpop.trf.xlu0 }
 0x1d5   : > { %v672_v62 = vpack.c.bf16 %v657_v61, %v656_v60 }
 0x1dc   : > { %v658_v63 = vpop.trf.xlu0 }
 0x1e4   : > { %v659_v0 = vpop.trf.xlu0 }
 0x1e5   : > { %v673_v1 = vpack.c.bf16 %v659_v0, %v658_v63 }
 0x1ec   : > { %v660_v2 = vpop.trf.xlu0 }
 0x1f4   : > { %v661_v3 = vpop.trf.xlu0 }
 0x1f5   : > { %v674_v4 = vpack.c.bf16 %v661_v3, %v660_v2 }
 0x1fc   : > { %v662_v5 = vpop.trf.xlu0 }
 0x204   : > { %v663_v6 = vpop.trf.xlu0 }
 0x205   : > { %v675_v7 = vpack.c.bf16 %v663_v6, %v662_v5 }
 0x207   : > { %892 = vset.pattern.permute.xlu0 %v903_v18 }
 0x20c   : > { %v664_v8 = vpop.trf.xlu0 }
 0x214   : > { %v665_v9 = vpop.trf.xlu0 }
 0x215   : > { %v676_v22 = vpack.c.bf16 %v665_v9, %v664_v8 }
 0x21c   : > { %v666_v10 = vpop.trf.xlu0 }
 0x224   : > { %v667_v12 = vpop.trf.xlu0 }
 0x225   : > { %v677_v21 = vpack.c.bf16 %v667_v12, %v666_v10 }
 0x22c   : > { %v668_v13 = vpop.trf.xlu0 }
 0x234   : > { %v669_v11 = vpop.trf.xlu0 }
 0x235   : > { %v678_v20 = vpack.c.bf16 %v669_v11, %v668_v13 }
 0x23c   : > { %v670_v14 = vpop.trf.xlu0 }
 0x244   : > { %v671_v15 = vpop.trf.xlu0 }
 0x245   : > { %v679_v16 = vpack.c.bf16 %v671_v15, %v670_v14 }
 0x247   : > { %687 = vmatpush.bf16.msrb.mxu2 %v679_v16 }
 0x24b   : > { %688 = vmatpush.bf16.msrb.mxu2 %v678_v20 }
 0x24f   : > { %689 = vmatpush.bf16.msrb.mxu2 %v677_v21 }
 0x253   : > { %690 = vmatpush.bf16.msrb.mxu2 %v676_v22 }
 0x257   : > { %691 = vmatpush.bf16.msrb.mxu2 %v675_v7 }
 0x25b   : > { %692 = vmatpush.bf16.msrb.mxu2 %v674_v4 }
 0x25f   : > { %693 = vmatpush.bf16.msrb.mxu2 %v673_v1 }
 0x263   : > { %694 = vmatpush.bf16.msrb.mxu2 %v672_v62 }
 0x266   : > { %695 = vmatmul.bf16.vlgmr.msrb.gmra.mxu2 %v680_v23 }
 0x2e9   : > { %v696_v25 = vpop.f32.mrf.mxu2 }
 0x2ea   : > { %v697_v26 = vadd.f32 %v696_v25, %v685_v24 }
 0x2ec   : > { %v700_v27 = vmax.f32 %v697_v26, 0.0 }
 0x2ee   : > { %v707_v29 = vmul.f32 %v705_v28, %v700_v27 }
 0x2f0   : > { %v708_v30 = vrot.slane %v707_v29, 4 }
 0x2f1   : > { %v698_v31 = vpop.f32.mrf.mxu2 }
 0x2f2   : > { %v709_v32 = vadd.f32 %v708_v30, %v707_v29 }
 0x2f4   : > { %v710_v33 = vrot.slane %v709_v32, 2 }
 0x2f6   : > { %v711_v34 = vadd.f32 %v710_v33, %v709_v32 }
 0x2f8   : > { %v712_v35 = vrot.slane %v711_v34, 1 }
 0x2fa   : > { %v713_v37 = vadd.f32 %v712_v35, %v711_v34 }
 0x2fc   : > { %v716_v38 = vadd.f32 %v715_v36, %v713_v37 }
 0x2fe   : > { %717 = vst [vmem:[%s331_s30] sm:$0x1] %v716_v38 }
 0x2ff PF: > { %s20_s11 = sadd.s32 1, %s901_s11  }
 0x300   : > { %p17_p5 = scmp.ge.s32.totalorder %s20_s11, 4  }
 0x302   :  { %19 = sbr.rel (!%p17_p5) target bundleno = 2 (0x2), region = 86 }

</bundles_post_ra>
